<compile_context>
chip_gen: v7x
topology: tpu7x:2x2x1
jax: 0.10.0
libtpu: 0.0.40
codegen_flags: <defaults>
</compile_context>

<pallas_src>
import functools

import jax
import jax.numpy as jnp
from jax.experimental import pallas as pl
from jax.experimental.pallas import tpu as pltpu


def _round_up(x, m):
    return ((x + m - 1) // m) * m


def _attention_kernel(gate_ref, skip_ref, wgT_ref, wxT_ref, bgx_ref,
                      wp_ref, bp_ref, out_ref, *, mxu_dtype=None):
    # gate_ref: (1, Fg, ts), skip_ref: (1, Fl, ts) -- spatial on the lane axis.
    g = gate_ref[0]                                   # (Fg, ts)
    x = skip_ref[0]                                   # (Fl, ts)

    # Optional narrow MXU operands: cast in-kernel (no extra HBM pass).
    g_m = g if mxu_dtype is None else g.astype(mxu_dtype)
    x_m = x if mxu_dtype is None else x.astype(mxu_dtype)

    # 1x1 convs as (nC, C) @ (C, ts): MXU, lane-dense output, f32 accumulate.
    g1 = jnp.dot(wgT_ref[...], g_m, preferred_element_type=jnp.float32)
    x1 = jnp.dot(wxT_ref[...], x_m, preferred_element_type=jnp.float32)
    a = jnp.maximum(g1 + x1 + bgx_ref[...], 0.0)      # (nC, ts) f32, ReLU

    # psi = sigmoid(conv1x1 to 1 channel): VPU mul + sublane (XLU) reduce over
    # nC -- keeps everything lane-dense (no 1-column MXU matmul).
    psi_lin = jnp.sum(a * wp_ref[...], axis=0, keepdims=True) + bp_ref[0, 0]
    psi = jax.nn.sigmoid(psi_lin)                     # (1, ts) f32

    # Gate the skip connection in its own dtype (channel broadcast = sublane op).
    out_ref[0] = (x * psi.astype(x.dtype)).astype(out_ref.dtype)


def _fold_bn(w, b, gamma, beta, mean, var, eps=1e-5):
    """Fold BatchNorm (eval) into a 1x1 conv expressed as (Cin, Cout) matmul."""
    scale = gamma / jnp.sqrt(var + eps)               # (Cout,)
    w_f = w * scale[None, :]                          # (Cin, Cout)
    b_f = (b - mean) * scale + beta                   # (Cout,)
    return w_f, b_f


def _vmem_capacity_bytes():
    try:
        return int(pltpu.get_tpu_info().vmem_capacity_bytes)
    except Exception:
        return 64 * 1024 * 1024   # conservative: v7x per-TC VMEM


def attention_block(gate, skip, params, *,
                    out_dtype=None,
                    mxu_dtype=None,
                    vmem_tile_budget_bytes=None):
    """gate, skip: NCHW. Returns skip * psi in NCHW.

    out_dtype: output storage dtype (default: skip.dtype).
    mxu_dtype: optional in-kernel cast for the matmul operands (e.g. bf16);
               inputs are streamed in their native dtype either way.
    """
    N, Fg, H, W = gate.shape
    _, Fl, _, _ = skip.shape
    nC = params["wg"].shape[1]
    S = H * W

    # Fold BN into each conv.
    wg, bg = _fold_bn(params["wg"], params["bg"],
                      params["bn_g_gamma"], params["bn_g_beta"],
                      params["bn_g_mean"], params["bn_g_var"])
    wx, bx = _fold_bn(params["wx"], params["bx"],
                      params["bn_x_gamma"], params["bn_x_beta"],
                      params["bn_x_mean"], params["bn_x_var"])
    wp, bp = _fold_bn(params["wp"], params["bp"],
                      params["bn_p_gamma"], params["bn_p_beta"],
                      params["bn_p_mean"], params["bn_p_var"])

    in_item = jnp.dtype(gate.dtype).itemsize
    out_dt = jnp.dtype(out_dtype) if out_dtype is not None else jnp.dtype(skip.dtype)
    out_item = out_dt.itemsize
    w_dt = jnp.dtype(mxu_dtype) if mxu_dtype is not None else jnp.dtype(gate.dtype)

    # NCHW -> (N, C, S): pure reshape (no HBM transpose / cast traffic).
    gate_m = gate.reshape(N, Fg, S)
    skip_m = skip.reshape(N, Fl, S)

    wgT = wg.T.astype(w_dt)                                # (nC, Fg)
    wxT = wx.T.astype(w_dt)                                # (nC, Fl)
    bgx = (bg + bx).reshape(nC, 1).astype(jnp.float32)     # combined biases
    wp_col = wp.reshape(nC, 1).astype(jnp.float32)         # psi conv weights
    bp_sc = bp.reshape(1, 1).astype(jnp.float32)           # scalar -> SMEM

    # ---- Spatial tile selection (lane axis) from a VMEM budget.
    # Counts double-buffered input/output tiles plus the f32 in-kernel
    # intermediates (g1/x1/a, gated product, psi) so the footprint is honest
    # on v7x's 64 MiB VMEM while letting ts grow large on v5e/v6e's 128 MiB.
    vmem_cap = _vmem_capacity_bytes()
    budget = (vmem_tile_budget_bytes if vmem_tile_budget_bytes is not None
              else vmem_cap // 2)
    per_lane = (2 * (Fg + Fl) * in_item        # double-buffered gate/skip tiles
                + 2 * Fl * out_item            # double-buffered output tile
                + 4 * (3 * nC + Fl + 1))       # f32 g1, x1, a, gated prod, psi
    ts_cap = max(128, (budget // per_lane) // 128 * 128)
    ts = min(_round_up(S, 128), ts_cap)
    # Keep the parallel grid >= 2 for single-image calls so v7x's second
    # TensorCore gets work (one extra ~0.35us grid step is noise on v5e/v6e).
    if N == 1 and _round_up(S, 128) > 128:
        ts = min(ts, _round_up(pl.cdiv(S, 2), 128))

    # Ragged last block is handled by Pallas (masked boundary stores); no
    # wrapper-side pad or trailing slice pass over HBM.
    grid = (N, pl.cdiv(S, ts))

    weights_bytes = nC * (Fg + Fl) * w_dt.itemsize + (2 * nC + 1) * 4
    footprint = per_lane * ts + weights_bytes
    vmem_limit = max(32 * 1024 * 1024, footprint + 4 * 1024 * 1024)
    vmem_limit = int(min(vmem_limit,
                         max(footprint + 2 * 1024 * 1024,
                             vmem_cap - 4 * 1024 * 1024)))

    cost = pl.CostEstimate(
        flops=int(2 * N * S * nC * (Fg + Fl) + N * S * (2 * nC + Fl + 2)),
        transcendentals=int(N * S),
        bytes_accessed=int(N * S * ((Fg + Fl) * in_item + Fl * out_item)
                           + weights_bytes),
    )

    full = lambda n, s: (0, 0)
    kernel = functools.partial(_attention_kernel, mxu_dtype=mxu_dtype)

    out_m = pl.pallas_call(
        kernel,
        out_shape=jax.ShapeDtypeStruct((N, Fl, S), out_dt),
        grid_spec=pltpu.PrefetchScalarGridSpec(
            num_scalar_prefetch=0,
            grid=grid,
            in_specs=[
                pl.BlockSpec((1, Fg, ts), lambda n, s: (n, 0, s)),  # gate
                pl.BlockSpec((1, Fl, ts), lambda n, s: (n, 0, s)),  # skip
                pl.BlockSpec((nC, Fg), full),                       # W_gate^T
                pl.BlockSpec((nC, Fl), full),                       # W_x^T
                pl.BlockSpec((nC, 1), full),                        # b_g + b_x
                pl.BlockSpec((nC, 1), full),                        # W_psi col
                pl.BlockSpec(memory_space=pltpu.MemorySpace.SMEM),  # b_psi
            ],
            out_specs=pl.BlockSpec((1, Fl, ts), lambda n, s: (n, 0, s)),
        ),
        compiler_params=pltpu.CompilerParams(
            dimension_semantics=("parallel", "parallel"),
            vmem_limit_bytes=vmem_limit),
        cost_estimate=cost,
    )(gate_m, skip_m, wgT, wxT, bgx, wp_col, bp_sc)

    # (N, Fl, S) -> NCHW (pure reshape).
    return out_m.reshape(N, Fl, H, W)


def init_params(key, F_g, F_l, n_coefficients):
    """Deterministic synthetic parameters matching the PyTorch module shapes.
    Conv weights stored as (Cin, Cout) matrices (1x1 conv == channel matmul).
    BatchNorm is in eval mode with synthetic running stats."""
    ks = jax.random.split(key, 9)
    p = {
        "wg": jax.random.normal(ks[0], (F_g, n_coefficients), jnp.float32) * 0.1,
        "bg": jax.random.normal(ks[1], (n_coefficients,), jnp.float32) * 0.1,
        "wx": jax.random.normal(ks[2], (F_l, n_coefficients), jnp.float32) * 0.1,
        "bx": jax.random.normal(ks[3], (n_coefficients,), jnp.float32) * 0.1,
        "wp": jax.random.normal(ks[4], (n_coefficients, 1), jnp.float32) * 0.1,
        "bp": jax.random.normal(ks[5], (1,), jnp.float32) * 0.1,
        "bn_g_gamma": jnp.ones((n_coefficients,), jnp.float32),
        "bn_g_beta": jnp.zeros((n_coefficients,), jnp.float32),
        "bn_g_mean": jax.random.normal(ks[6], (n_coefficients,), jnp.float32) * 0.05,
        "bn_g_var": jnp.ones((n_coefficients,), jnp.float32),
        "bn_x_gamma": jnp.ones((n_coefficients,), jnp.float32),
        "bn_x_beta": jnp.zeros((n_coefficients,), jnp.float32),
        "bn_x_mean": jax.random.normal(ks[7], (n_coefficients,), jnp.float32) * 0.05,
        "bn_x_var": jnp.ones((n_coefficients,), jnp.float32),
        "bn_p_gamma": jnp.ones((1,), jnp.float32),
        "bn_p_beta": jnp.zeros((1,), jnp.float32),
        "bn_p_mean": jax.random.normal(ks[8], (1,), jnp.float32) * 0.05,
        "bn_p_var": jnp.ones((1,), jnp.float32),
    }
    return p


def reference_jax(gate, skip, params):
    """Pure-JAX reference of the same (eval-mode) forward pass."""
    wg, bg = _fold_bn(params["wg"], params["bg"],
                      params["bn_g_gamma"], params["bn_g_beta"],
                      params["bn_g_mean"], params["bn_g_var"])
    wx, bx = _fold_bn(params["wx"], params["bx"],
                      params["bn_x_gamma"], params["bn_x_beta"],
                      params["bn_x_mean"], params["bn_x_var"])
    wp, bp = _fold_bn(params["wp"], params["bp"],
                      params["bn_p_gamma"], params["bn_p_beta"],
                      params["bn_p_mean"], params["bn_p_var"])
    g = jnp.transpose(gate, (0, 2, 3, 1))
    s = jnp.transpose(skip, (0, 2, 3, 1))
    g1 = jnp.einsum("nhwc,cd->nhwd", g, wg) + bg
    x1 = jnp.einsum("nhwc,cd->nhwd", s, wx) + bx
    a = jnp.maximum(g1 + x1, 0.0)
    psi = jax.nn.sigmoid(jnp.einsum("nhwc,cd->nhwd", a, wp) + bp)
    return jnp.transpose(s * psi, (0, 3, 1, 2))


if __name__ == "__main__":
    # TODO(synk): BatchNorm implemented with eval-mode running stats (folded);
    # PyTorch training-mode batch statistics are not reproduced.
    key = jax.random.PRNGKey(0)

    # Test 1: small, lane-aligned spatial extent.
    F_g, F_l, n_coef = 4, 4, 8
    N, H, W = 2, 16, 16
    k_gate, k_skip, k_param, k2 = jax.random.split(key, 4)
    gate = jax.random.normal(k_gate, (N, F_g, H, W), jnp.float32)
    skip = jax.random.normal(k_skip, (N, F_l, H, W), jnp.float32)
    params = init_params(k_param, F_g, F_l, n_coef)

    out = jax.block_until_ready(attention_block(gate, skip, params))
    ref = jax.block_until_ready(reference_jax(gate, skip, params))
    assert out.shape == (N, F_l, H, W)
    assert jnp.max(jnp.abs(out - ref)) < 1e-5

    # Test 2: N == 1 (megacore split path) and S not a multiple of the tile
    # (exercises the ragged last block with masked boundary stores).
    F_g2, F_l2, n_coef2 = 6, 6, 5
    N2, H2, W2 = 1, 9, 15
    k_gate2, k_skip2, k_param2 = jax.random.split(k2, 3)
    gate2 = jax.random.normal(k_gate2, (N2, F_g2, H2, W2), jnp.float32)
    skip2 = jax.random.normal(k_skip2, (N2, F_l2, H2, W2), jnp.float32)
    params2 = init_params(k_param2, F_g2, F_l2, n_coef2)

    out2 = jax.block_until_ready(attention_block(gate2, skip2, params2))
    ref2 = jax.block_until_ready(reference_jax(gate2, skip2, params2))
    assert out2.shape == (N2, F_l2, H2, W2)
    assert jnp.max(jnp.abs(out2 - ref2)) < 1e-4

    print("KERNEL_OK")
</pallas_src>

<mosaic_0001>
module attributes {stable_mosaic.version = 11 : i64} {
  func.func @_attention_kernel(%arg0: i32, %arg1: i32, %arg2: memref<1x4x256xf32, #tpu.memory_space<vmem>>, %arg3: memref<1x4x256xf32, #tpu.memory_space<vmem>>, %arg4: memref<8x4xf32, #tpu.memory_space<vmem>>, %arg5: memref<8x4xf32, #tpu.memory_space<vmem>>, %arg6: memref<8x1xf32, #tpu.memory_space<vmem>>, %arg7: memref<8x1xf32, #tpu.memory_space<vmem>>, %arg8: memref<1x1xf32, #tpu.memory_space<smem>>, %arg9: memref<1x4x256xf32, #tpu.memory_space<vmem>>) attributes {dimension_semantics = [#tpu.dimension_semantics<parallel>, #tpu.dimension_semantics<parallel>], iteration_bounds = array<i64: 2, 1>, scalar_prefetch = 0 : i64, scratch_operands = 0 : i64, tpu.core_type = #tpu.core_type<tc>, window_params = [{transform_indices = @transform_0, window_bounds = array<i64: 1, 4, 256>}, {transform_indices = @transform_1, window_bounds = array<i64: 1, 4, 256>}, {pipeline_mode = #tpu.pipeline_mode<synchronous>, transform_indices = @transform_2, window_bounds = array<i64: 8, 4>}, {pipeline_mode = #tpu.pipeline_mode<synchronous>, transform_indices = @transform_3, window_bounds = array<i64: 8, 4>}, {pipeline_mode = #tpu.pipeline_mode<synchronous>, transform_indices = @transform_4, window_bounds = array<i64: 8, 1>}, {pipeline_mode = #tpu.pipeline_mode<synchronous>, transform_indices = @transform_5, window_bounds = array<i64: 8, 1>}, {transform_indices = @transform_6, window_bounds = array<i64: 1, 1>}, {transform_indices = @transform_7, window_bounds = array<i64: 1, 4, 256>}]} {
    %c0 = arith.constant 0 : index
    %c0_0 = arith.constant 0 : index
    %c0_1 = arith.constant 0 : index
    %0 = vector.load %arg2[%c0, %c0_0, %c0_1] : memref<1x4x256xf32, #tpu.memory_space<vmem>>, vector<1x4x256xf32>
    %1 = vector.shape_cast %0 : vector<1x4x256xf32> to vector<4x256xf32>
    %c0_2 = arith.constant 0 : index
    %c0_3 = arith.constant 0 : index
    %c0_4 = arith.constant 0 : index
    %2 = vector.load %arg3[%c0_2, %c0_3, %c0_4] : memref<1x4x256xf32, #tpu.memory_space<vmem>>, vector<1x4x256xf32>
    %3 = vector.shape_cast %2 : vector<1x4x256xf32> to vector<4x256xf32>
    %c0_5 = arith.constant 0 : index
    %c0_6 = arith.constant 0 : index
    %4 = vector.load %arg4[%c0_5, %c0_6] : memref<8x4xf32, #tpu.memory_space<vmem>>, vector<8x4xf32>
    %cst = arith.constant dense<0.000000e+00> : vector<8x256xf32>
    %5 = tpu.matmul %4, %1, %cst {dimension_numbers = #tpu.dot_dimension_numbers<[1], [0], [0], [1], [0, 0, 1, 1], [], []>} : vector<8x4xf32>, vector<4x256xf32>, vector<8x256xf32> -> vector<8x256xf32>
    %c0_7 = arith.constant 0 : index
    %c0_8 = arith.constant 0 : index
    %6 = vector.load %arg5[%c0_7, %c0_8] : memref<8x4xf32, #tpu.memory_space<vmem>>, vector<8x4xf32>
    %cst_9 = arith.constant dense<0.000000e+00> : vector<8x256xf32>
    %7 = tpu.matmul %6, %3, %cst_9 {dimension_numbers = #tpu.dot_dimension_numbers<[1], [0], [0], [1], [0, 0, 1, 1], [], []>} : vector<8x4xf32>, vector<4x256xf32>, vector<8x256xf32> -> vector<8x256xf32>
    %8 = arith.addf %5, %7 : vector<8x256xf32>
    %c0_10 = arith.constant 0 : index
    %c0_11 = arith.constant 0 : index
    %9 = vector.load %arg6[%c0_10, %c0_11] : memref<8x1xf32, #tpu.memory_space<vmem>>, vector<8x1xf32>
    %10 = vector.broadcast %9 : vector<8x1xf32> to vector<8x256xf32>
    %11 = arith.addf %8, %10 : vector<8x256xf32>
    %cst_12 = arith.constant 0.000000e+00 : f32
    %12 = vector.broadcast %cst_12 : f32 to vector<8x256xf32>
    %13 = arith.maximumf %11, %12 : vector<8x256xf32>
    %c0_13 = arith.constant 0 : index
    %c0_14 = arith.constant 0 : index
    %14 = vector.load %arg7[%c0_13, %c0_14] : memref<8x1xf32, #tpu.memory_space<vmem>>, vector<8x1xf32>
    %15 = vector.broadcast %14 : vector<8x1xf32> to vector<8x256xf32>
    %16 = arith.mulf %13, %15 : vector<8x256xf32>
    %cst_15 = arith.constant dense<0.000000e+00> : vector<256xf32>
    %17 = vector.multi_reduction <add>, %16, %cst_15 [0] : vector<8x256xf32> to vector<256xf32>
    %18 = vector.shape_cast %17 : vector<256xf32> to vector<1x256xf32>
    %c0_16 = arith.constant 0 : index
    %c0_17 = arith.constant 0 : index
    %19 = memref.load %arg8[%c0_16, %c0_17] : memref<1x1xf32, #tpu.memory_space<smem>>
    %20 = vector.broadcast %19 : f32 to vector<1x256xf32>
    %21 = arith.addf %18, %20 : vector<1x256xf32>
    %22 = arith.negf %21 : vector<1x256xf32>
    %23 = math.exp %22 : vector<1x256xf32>
    %cst_18 = arith.constant 1.000000e+00 : f32
    %24 = vector.broadcast %cst_18 : f32 to vector<1x256xf32>
    %25 = arith.addf %24, %23 : vector<1x256xf32>
    %26 = arith.divf %24, %25 : vector<1x256xf32>
    %27 = vector.broadcast %26 : vector<1x256xf32> to vector<4x256xf32>
    %28 = arith.mulf %3, %27 : vector<4x256xf32>
    %c0_19 = arith.constant 0 : index
    %c0_20 = arith.constant 0 : index
    %c0_21 = arith.constant 0 : index
    %29 = vector.load %arg9[%c0_19, %c0_20, %c0_21] : memref<1x4x256xf32, #tpu.memory_space<vmem>>, vector<1x4x256xf32>
    %30 = vector.shape_cast %29 : vector<1x4x256xf32> to vector<4x256xf32>
    %31 = vector.shape_cast %28 : vector<4x256xf32> to vector<1x4x256xf32>
    tpu.vector_store %arg9[%c0_19, %c0_20, %c0_21], %31 {strides = array<i32>} : memref<1x4x256xf32, #tpu.memory_space<vmem>>, vector<1x4x256xf32>,
    return
  }
  func.func @transform_0(%arg0: i32, %arg1: i32) -> (i32, i32, i32) {
    %c0_i32 = arith.constant 0 : i32
    %c0_i32_0 = arith.constant 0 : i32
    return %arg0, %c0_i32, %arg1 : i32, i32, i32
  }
  func.func @transform_1(%arg0: i32, %arg1: i32) -> (i32, i32, i32) {
    %c0_i32 = arith.constant 0 : i32
    %c0_i32_0 = arith.constant 0 : i32
    return %arg0, %c0_i32, %arg1 : i32, i32, i32
  }
  func.func @transform_2(%arg0: i32, %arg1: i32) -> (i32, i32) {
    %c0_i32 = arith.constant 0 : i32
    %c0_i32_0 = arith.constant 0 : i32
    %c0_i32_1 = arith.constant 0 : i32
    return %c0_i32, %c0_i32_0 : i32, i32
  }
  func.func @transform_3(%arg0: i32, %arg1: i32) -> (i32, i32) {
    %c0_i32 = arith.constant 0 : i32
    %c0_i32_0 = arith.constant 0 : i32
    %c0_i32_1 = arith.constant 0 : i32
    return %c0_i32, %c0_i32_0 : i32, i32
  }
  func.func @transform_4(%arg0: i32, %arg1: i32) -> (i32, i32) {
    %c0_i32 = arith.constant 0 : i32
    %c0_i32_0 = arith.constant 0 : i32
    %c0_i32_1 = arith.constant 0 : i32
    return %c0_i32, %c0_i32_0 : i32, i32
  }
  func.func @transform_5(%arg0: i32, %arg1: i32) -> (i32, i32) {
    %c0_i32 = arith.constant 0 : i32
    %c0_i32_0 = arith.constant 0 : i32
    %c0_i32_1 = arith.constant 0 : i32
    return %c0_i32, %c0_i32_0 : i32, i32
  }
  func.func @transform_6(%arg0: i32, %arg1: i32) -> (i32, i32) {
    %c0_i32 = arith.constant 0 : i32
    %c0_i32_0 = arith.constant 0 : i32
    %c0_i32_1 = arith.constant 0 : i32
    return %c0_i32, %c0_i32_0 : i32, i32
  }
  func.func @transform_7(%arg0: i32, %arg1: i32) -> (i32, i32, i32) {
    %c0_i32 = arith.constant 0 : i32
    %c0_i32_0 = arith.constant 0 : i32
    return %arg0, %c0_i32, %arg1 : i32, i32, i32
  }
}

</mosaic_0001>

<bundles_post_ra>
// kernel: tpu_custom_call.1
= control target key start
LH: loop header
LB: loop body
LE: loop exit
PB: predicated region body
PF: predicated region fallthrough
CT: control target
= control target key end

     0   :  { %s1029_s0 = inlined_call_operand.vmem [shape: f32[2,4,256], index: 0, kind: input, shape index: {}]   ;;  %s1030_s1 = inlined_call_operand.vmem [shape: f32[2,4,256], index: 1, kind: input, shape index: {}]   ;;  %s1031_s2 = inlined_call_operand.vmem [shape: f32[8,4], index: 2, kind: input, shape index: {}]   ;;  %s1032_s3 = inlined_call_operand.vmem [shape: f32[8,4], index: 3, kind: input, shape index: {}]   ;;  %s1033_s4 = inlined_call_operand.vmem [shape: f32[8,1], index: 4, kind: input, shape index: {}]   ;;  %s1034_s5 = inlined_call_operand.vmem [shape: f32[8,1], index: 5, kind: input, shape index: {}]   ;;  %s1035_s6 = inlined_call_operand.<no memory space> [shape: f32[1,1], index: 6, kind: input, shape index: {}]   ;;  %s1036_s7 = inlined_call_operand.hbm [shape: f32[2,4,256], index: 7, kind: output, shape index: {}]  }
   0x1   :  { %12 = sst [smem:[#allocation2]] %s1035_s6 }
   0x2   :  { %13 = vsyncpa [#allocation4], 0 }
   0x3   :  { %15 = vsyncpa [#allocation4 + $0x1], 0  ;;  %s896_s26 = smov 0   ;;  %s898_s27 = smov 0  }
   0x4   :  { %s900_s28 = smov 0   ;;  %s902_s29 = smov 0  }
   0x5   :  { %s904_s30 = smov 0   ;;  %s906_s8 = smov 0  }
   0x6 LB: > { %s674_s6 = sadd.s32 4294967295, %s848_s8   ;;  %s675_s9 = sadd.s32 4294967294, %s848_s8   ;;  %s848_s8 = sphi %s906_s8, %s21_s8   ;;  %s844_s30 = sphi %s904_s30, %s1043_s30   ;;  %s840_s29 = sphi %s902_s29, %s1042_s29   ;;  %s836_s28 = sphi %s900_s28, %s1041_s28   ;;  %s832_s27 = sphi %s898_s27, %s1040_s27   ;;  %s828_s26 = sphi %s896_s26, %s1039_s26  }
   0x7   : > { %s33_s10 = sadd.s32 1, %s844_s30  ;;  %s203_s11 = sadd.s32 1, %s836_s28 }
   0x8   : > { %p35_p0 = scmp.ge.s32.totalorder %s33_s10, 2  ;;  %p213_p1 = scmp.ne.s32.totalorder %s836_s28, %s832_s27 }
   0x9   : > { %p214_p2 = scmp.eq.s32.totalorder %s674_s6, 1  ;;  %p219_p3 = scmp.ne.s32.totalorder %s832_s27, %s828_s26 }
   0xa   : > { %s1045_s10 = smov (%p35_p0, %s33_s10), 0  ;;  %p220_p5 = scmp.eq.s32.totalorder %s675_s9, 1 }
   0xb   : > { %p936_p4 = por %p214_p2, %p213_p1  ;;  %s198_s13 = ssub.s32 %s844_s30, %s1045_s10 }
   0xc   : > { %p678_p6 = scmp.ge.s32.totalorder %s848_s8, 1  ;;  %p201_p7 = scmp.eq.s32.totalorder %s198_s13, 0 }
   0xd   : > { %p943_p8 = por %p220_p5, %p219_p3  ;;  %p279_p9 = scmp.lt.s32.totalorder %s848_s8, 3 }
   0xe   : > { %s949_s15 = scalar_select %p201_p7, %s836_s28, %s203_s11  }
   0xf   : > { %p280_p10 = pnand %p678_p6, %p279_p9 }
  0x10   : > { %p325_p11 = scmp.lt.s32.totalorder (!%p280_p10), %s840_s29, 1  ;;  %v850_v0 = vmov (!%p280_p10), 0.0   ;;  %v511_v1 = vld [vmem:[%s1033_s4] sm:$0xff] (!%p280_p10)  ;;  %v851_v2 = vmov (!%p280_p10), 0   ;;  %vm355_vm0 = vcmask (!%p280_p10), 1043456   ;;  %vm351_vm1 = vcmask (!%p280_p10), 31744  }
  0x11   : > { %283 = sbr.rel (%p280_p10) target bundleno = 313 (0x139), region = 48  ;;  %424 = vmatprep.mubr.f32.mxu1 (!%p280_p10), %v850_v0  ;;  %504 = vmatprep.mubr.f32.mxu0 (!%p280_p10), %v850_v0  ;;  %v521_v3 = vld [vmem:[%s1034_s5] sm:$0xff] (!%p280_p10)  ;;  %s699_s21 = sshll.u32 (!%p280_p10), %s840_s29, 7 }
  0x12   : > { %759 = vset.pattern.permute.xlu0 (!%p280_p10), %v851_v2  ;;  %v348_v8 = vld [vmem:[%s1032_s3] sm:$0xff] (!%p280_p10)  ;;  %s982_s6 = scalar_lea.hbm (!%p280_p10), %s1036_s7, %s699_s21 }
  0x13   : > { %514 = vperm.xlu0 (!%p280_p10), %759, %v511_v1   ;;  %v347_v9 = vld [vmem:[%s1031_s2] sm:$0xff] (!%p280_p10) }
  0x17   : > { %524 = vperm.xlu0 (!%p280_p10), %759, %v521_v3  }
  0x18   : > { %s326_s18 = scalar_select %p325_p11, %s840_s29, 1 }
  0x19   : > { %s852_s29 = smov [#allocation3]  }
  0x1a   : > { %s697_s19 = sshll.u32 %s326_s18, 3  ;;  %s541_s18 = sld [smem:[#allocation2]] }
  0x1b   : > { %s342_s24 = scalar_lea.vmem %s1030_s1, %s697_s19  ;;  %s332_s9 = scalar_lea.vmem %s1029_s0, %s697_s19 }
  0x1c   : > { %v965_v4 = vld [vmem:[%s342_s24] sm:$0xff]  ;;  %s321_s19 = sand.u32 1, %s832_s27   ;;  %s774_s13 = sshll.u32 %s852_s29, 4  ;;  %s775_s13 = int_to_ptr.vmem [resolvable:$false] %s774_s13 }
  0x1d   : > { %v345_v5 = vld [vmem:[%s332_s9] sm:$0xff]  ;;  %v350_v6 = vcombine.high %v965_v4, %v965_v4  ;;  %s679_s20 = sshll.u32 %s321_s19, 3  ;;  %s564_s9 = scalar_lea.sflag [#allocation4], %s321_s19 }
  0x1e   : > { %v432_v7 = vcombine.high %v345_v5, %v345_v5  ;;  %s323_s22 = scalar_lea.vmem [#allocation3], %s679_s20  ;;  %s776_s16 = scalar_lea.vmem %s775_s13, 256 }
  0x1f   : > { %684 = vmatprep.subr.msk.mxu1 %vm355_vm0, %v350_v6  ;;  %s580_s23 = sshll.u32 %s323_s22, 4  ;;  %s984_s23 = int_to_ptr.vmem [resolvable:$true] %s580_s23 }
  0x20   : > { %687 = vmatprep.subr.msk.mxu0 %vm355_vm0, %v432_v7  ;;  %685 = vmatpush1.msk.msra.mxu1 %vm355_vm0, %v965_v4  ;;  %v542_v33 = vstv %s541_s18  ;;  %s770_s11 = scalar_lea.vmem %s984_s23, 128  ;;  %p777_p1 = scmp.lt.s32.totalorder %s984_s23, %s775_s13 }
  0x21   : > { %688 = vmatpush1.msk.msra.mxu0 %vm355_vm0, %v345_v5  ;;  %686 = vmatmul.mubr.msk.f32.vlgmr.msra.gmra.mrb[0].mxu1 %vm351_vm1, %v348_v8  ;;  %p771_p12 = scmp.ne.s32.totalorder %s984_s23, %s770_s11  ;;  %p778_p2 = scmp.lt.s32.totalorder %s776_s16, %s770_s11 }
  0x22   : > { %689 = vmatmul.mubr.msk.f32.vlgmr.msra.gmra.mrb[0].mxu0 %vm351_vm1, %v347_v9 }
  0x23   : > { %p772_p13 = pnand %p771_p12, %p936_p4  ;;  %p779_p3 = por %p778_p2, %p777_p1 }
  0x25   : > { %p773_p0 = pneg %p772_p13 }
  0x27   : > { %p780_p5 = pnand %p779_p3, %p773_p0 }
  0x92   : > { %v515_v10 = vpop.permute.xlu0 %514 }
  0x96   : > { %v525_v20 = vpop.permute.xlu0 %524 }
  0xf4   : > { %v426_v11 = vpop.f32.mrb[0].mxu1 }
  0xf5   : > { %v506_v12 = vpop.f32.mrb[0].mxu0  ;;  %v428_v14 = vpop.f32.mrb[1].mxu1 }
  0xf6   : > { %v507_v13 = vadd.f32 %v506_v12, %v426_v11  ;;  %v508_v15 = vpop.f32.mrb[1].mxu0 }
  0xf7   : > { %v509_v16 = vadd.f32 %v508_v15, %v428_v14 }
  0xf8   : > { %v517_v17 = vadd.f32 %v515_v10, %v507_v13 }
  0xf9   : > { %v518_v18 = vadd.f32 %v515_v10, %v509_v16 }
  0xfa   : > { %v519_v19 = vmax.f32 %v517_v17, 0.0 }
  0xfb   : > { %v520_v21 = vmax.f32 %v518_v18, 0.0 }
  0xfc   : > { %v527_v22 = vmul.f32 %v525_v20, %v519_v19 }
  0xfd   : > { %v528_v23 = vmul.f32 %v525_v20, %v520_v21 }
  0xfe   : > { %v529_v24 = vrot.slane %v527_v22, 4 }
  0xff   : > { %v535_v25 = vrot.slane %v528_v23, 4 }
 0x100   : > { %v530_v26 = vadd.f32 %v529_v24, %v527_v22 }
 0x101   : > { %v536_v27 = vadd.f32 %v535_v25, %v528_v23 }
 0x102   : > { %v531_v28 = vrot.slane %v530_v26, 2 }
 0x103   : > { %v537_v29 = vrot.slane %v536_v27, 2 }
 0x104   : > { %v532_v30 = vadd.f32 %v531_v28, %v530_v26 }
 0x105   : > { %v538_v31 = vadd.f32 %v537_v29, %v536_v27 }
 0x106   : > { %v533_v32 = vrot.slane %v532_v30, 1 }
 0x107   : > { %v539_v34 = vrot.slane %v538_v31, 1 }
 0x108   : > { %v534_v35 = vadd.f32 %v533_v32, %v532_v30 }
 0x109   : > { %v540_v36 = vadd.f32 %v539_v34, %v538_v31 }
 0x10a   : > { %v543_v37 = vadd.f32 %v542_v33, %v534_v35 }
 0x10b   : > { %v544_v38 = vadd.f32 %v542_v33, %v540_v36 }
 0x10c   : > { %v690_v39 = vmul.f32 -1.442695, %v543_v37 }
 0x10d   : > { %v691_v40 = vmul.f32 -1.442695, %v544_v38 }
 0x10e   : > { %762 = vpow2.f32 %v690_v39 }
 0x10f   : > { %764 = vpow2.f32 %v691_v40 }
 0x118   : > { %v763_v41 = vpop.eup %762 }
 0x119   : > { %v765_v42 = vpop.eup %764  ;;  %v551_v43 = vadd.f32 1.0, %v763_v41 }
 0x11a   : > { %v552_v44 = vadd.f32 1.0, %v765_v42 }
 0x11b   : > { %766 = vrcp.f32 %v551_v43 }
 0x11c   : > { %768 = vrcp.f32 %v552_v44 }
 0x125   : > { %v767_v45 = vpop.eup %766 }
 0x126   : > { %v769_v46 = vpop.eup %768 }
 0x127   : > { %v559_v47 = vcombine.low %v767_v45, %v769_v46 }
 0x129   : > { %v561_v48 = vmul.f32 %v559_v47, %v965_v4 }
 0x12b   : > { %562 = vst [vmem:[%s323_s22] sm:$0xff] %v561_v48 }
 0x12c   : > { %783 = shalt.err (!%p780_p5)
}
 0x12d   : > { %s784_s17 = scalar_lea.hbm %s982_s6, 128  ;;  %s788_s20 = scalar_lea.hbm %s1036_s7, 256 }
 0x12e   : > { %p785_p6 = scmp.ne.s32.totalorder %s982_s6, %s784_s17  ;;  %p789_p10 = scmp.lt.u32.totalorder %s982_s6, %s1036_s7 }
 0x12f   : > { %p790_p11 = scmp.lt.u32.totalorder %s788_s20, %s784_s17  ;;  %p792_p13 = scmp.lt.u32.totalorder %s784_s17, %s982_s6 }
 0x130   : > { %p786_p7 = pnand %p785_p6, %p936_p4 }
 0x131   : > { %p791_p12 = por %p790_p11, %p789_p10 }
 0x132   : > { %p787_p9 = pneg %p786_p7 }
 0x133   : > { %p793_p0 = por %p792_p13, %p791_p12 }
 0x135   : > { %p794_p1 = pnand %p793_p0, %p787_p9 }
 0x137   : > { %797 = shalt.err (!%p794_p1)
}
 0x138   : > { %702 = dma.vmem_to_hbm [thread:$0]  (%p936_p4), %s984_s23, 128, %s982_s6, %s564_s9  }
 0x139 PF: > { %p708_p2 = scmp.ge.s32.totalorder %s848_s8, 2  ;;  %s592_s24 = sand.u32 1, %s828_s26  }
 0x13a   : > { %s593_s25 = scalar_lea.sflag [#allocation4], %s592_s24 }
 0x13b   : > { %p705_p3 = pnand %p708_p2, %p943_p8 }
 0x13d   : > { %823 = dma.done.wait (!%p705_p3), %s593_s25, 128  }
 0x13e   : > { %825 = vsyncadd (!%p705_p3), %s593_s25, 4294967168  ;;  %s21_s8 = sadd.s32 1, %s848_s8   ;;  %s1039_s26 = smov %s832_s27 }
 0x13f   : > { %p18_p5 = scmp.ge.s32.totalorder %s21_s8, 4   ;;  %s1040_s27 = smov %s836_s28 }
 0x140   : > { %s1041_s28 = smov %s949_s15  ;;  %s1042_s29 = smov %s844_s30 }
 0x141   : > { %s1043_s30 = smov %s1045_s10  ;;  %20 = sbr.rel (!%p18_p5) target bundleno = 6 (0x6), region = 86 }
 0x148   :  { %598 = vsyncpa [#allocation4], 1 }
 0x149   :  { %600 = vsyncpa [#allocation4 + $0x1], 1 }

</bundles_post_ra>
